<compile_context>
chip_gen: v7x
topology: tpu7x:2x2x1
jax: 0.10.0
libtpu: 0.0.40
codegen_flags: <defaults>
</compile_context>

<pallas_src>
import math

import jax
import jax.numpy as jnp
from jax.experimental import pallas as pl
from jax.experimental.pallas import tpu as pltpu

HIDDEN = 50          # hidden_dim of the module
HIDDEN_PAD = 56      # pad 50 -> 56 (multiple of 8) for sublane alignment; exact
NUM_LAYERS = 6       # num_layers of the module
DIN = 2              # input features
DOUT = 1             # output features


def _mlp_kernel(xt_ref, w_in_ref, b_in_ref, w_h_ref, b_h_ref,
                w_out_ref, b_out_ref, o_ref):
    """One tile of points (lane axis) through the whole shared-weight MLP.

    xt_ref:  (DIN, TM)          input points, transposed (points along lanes)
    w_*:     torch [out, in] layout, HIDDEN padded to HIDDEN_PAD
    o_ref:   (1, TM)            lane-dense output row
    """
    x0 = xt_ref[0:1, :]                         # (1, TM)
    x1 = xt_ref[1:2, :]                         # (1, TM)
    w_in = w_in_ref[...]                        # (HP, 2)
    b_in = b_in_ref[...]                        # (HP, 1)

    # First Linear (in=2) as a VPU broadcast-FMA: avoids a K=2 MXU round-trip.
    h = w_in[:, 0:1] * x0 + w_in[:, 1:2] * x1 + b_in        # (HP, TM)

    # Hoist the shared hidden weights/bias out of the unrolled layer loop.
    w_h = w_h_ref[...]                          # (HP, HP)
    b_h = b_h_ref[...]                          # (HP, 1)
    for _ in range(NUM_LAYERS):                 # shared weights each iteration
        h = jnp.dot(w_h, jnp.tanh(h),
                    preferred_element_type=jnp.float32) + b_h

    # Output Linear (HP -> 1) as a single M=1 matmul -> lane-dense (1, TM).
    out = jnp.dot(w_out_ref[...], jnp.tanh(h),
                  preferred_element_type=jnp.float32) + b_out_ref[...]
    o_ref[...] = out.astype(o_ref.dtype)


def nn_v_forward(x, prep_params, *, tm=512):
    """x: [L, 2] float32 -> [L, 1] float32.  prep_params from prepare_params()."""
    w_in, b_in, w_h, b_h, w_out, b_out = prep_params
    n = x.shape[0]

    # Lane tile: multiple of 128, clamped so tiny inputs are a single block.
    tm = pl.cdiv(tm, 128) * 128
    n128 = pl.cdiv(n, 128) * 128
    tm_eff = min(tm, n128)
    n_pad = pl.cdiv(n, tm_eff) * tm_eff

    # Transpose points to (2, n_pad): lane-dense loads, lane-dense compute.
    xt = jnp.zeros((DIN, n_pad), jnp.float32).at[:, :n].set(x.T)

    grid = (n_pad // tm_eff,)
    full = lambda i: (0, 0)   # weights: same whole-array block every step

    out = pl.pallas_call(
        _mlp_kernel,
        out_shape=jax.ShapeDtypeStruct((1, n_pad), jnp.float32),
        grid_spec=pltpu.PrefetchScalarGridSpec(
            num_scalar_prefetch=0,
            grid=grid,
            in_specs=[
                pl.BlockSpec((DIN, tm_eff), lambda i: (0, i)),    # x (transposed)
                pl.BlockSpec((HIDDEN_PAD, DIN), full),            # W_in  [out,in]
                pl.BlockSpec((HIDDEN_PAD, 1), full),              # b_in
                pl.BlockSpec((HIDDEN_PAD, HIDDEN_PAD), full),     # W_h (shared)
                pl.BlockSpec((HIDDEN_PAD, 1), full),              # b_h (shared)
                pl.BlockSpec((1, HIDDEN_PAD), full),              # W_out
                pl.BlockSpec((1, 1), full),                       # b_out
            ],
            out_specs=pl.BlockSpec((1, tm_eff), lambda i: (0, i)),
        ),
        compiler_params=pltpu.CompilerParams(
            dimension_semantics=("parallel",)),
    )(xt, w_in, b_in, w_h, b_h, w_out, b_out)

    return out[0, :n].reshape(n, 1)


def init_params(key):
    """torch.nn.Linear-style params: weight [out, in], bias [out],
    both ~ U(-1/sqrt(fan_in), 1/sqrt(fan_in))."""
    def linear(k, fan_in, fan_out):
        kw, kb = jax.random.split(k)
        bound = 1.0 / math.sqrt(fan_in)
        w = jax.random.uniform(kw, (fan_out, fan_in), jnp.float32, -bound, bound)
        b = jax.random.uniform(kb, (fan_out,), jnp.float32, -bound, bound)
        return w, b

    k_in, k_h, k_out = jax.random.split(key, 3)
    w_in, b_in = linear(k_in, DIN, HIDDEN)
    w_h, b_h = linear(k_h, HIDDEN, HIDDEN)      # shared hidden layer
    w_out, b_out = linear(k_out, HIDDEN, DOUT)
    return (w_in, b_in, w_h, b_h, w_out, b_out)


def prepare_params(params):
    """One-time prep: zero-pad HIDDEN 50 -> 56 (exact: tanh(0)=0 and padded
    rows/cols contribute nothing) and shape biases as columns for the
    transposed-orientation kernel."""
    w_in, b_in, w_h, b_h, w_out, b_out = params
    hp = HIDDEN_PAD
    w_in_p = jnp.zeros((hp, DIN), jnp.float32).at[:HIDDEN, :].set(w_in)
    b_in_p = jnp.zeros((hp, 1), jnp.float32).at[:HIDDEN, 0].set(b_in)
    w_h_p = jnp.zeros((hp, hp), jnp.float32).at[:HIDDEN, :HIDDEN].set(w_h)
    b_h_p = jnp.zeros((hp, 1), jnp.float32).at[:HIDDEN, 0].set(b_h)
    w_out_p = jnp.zeros((DOUT, hp), jnp.float32).at[:, :HIDDEN].set(w_out)
    b_out_p = b_out.reshape(1, 1)
    return (w_in_p, b_in_p, w_h_p, b_h_p, w_out_p, b_out_p)


def reference_forward(x, params):
    """Pure-JAX reference of the PyTorch forward (torch weight layout)."""
    w_in, b_in, w_h, b_h, w_out, b_out = params
    h = x @ w_in.T + b_in
    for _ in range(NUM_LAYERS):
        h = jnp.tanh(h) @ w_h.T + b_h
    return jnp.tanh(h) @ w_out.T + b_out


# TODO(synk): the module's backward()/self.loss is training machinery, not part
# of the forward pass, so it is not translated.

if __name__ == "__main__":
    key = jax.random.PRNGKey(0)
    k_x, k_p = jax.random.split(key)

    # [L, C] with L=100 points (as in the module's context), C=2 coordinates.
    x = jax.random.uniform(k_x, (100, DIN), jnp.float32, -0.5, 1.5)
    params = init_params(k_p)
    prep = prepare_params(params)          # one-time weight prep (outside fwd)

    fwd = jax.jit(nn_v_forward)
    y = jax.block_until_ready(fwd(x, prep))

    y_ref = reference_forward(x, params)
    assert y.shape == (100, 1)
    assert jnp.allclose(y, y_ref, atol=1e-5, rtol=1e-5), "mismatch vs reference"

    print("KERNEL_OK")
</pallas_src>

<mosaic_0001>
module attributes {stable_mosaic.version = 11 : i64} {
  func.func @_mlp_kernel(%arg0: i32, %arg1: memref<2x128xf32, #tpu.memory_space<vmem>>, %arg2: memref<56x2xf32, #tpu.memory_space<vmem>>, %arg3: memref<56x1xf32, #tpu.memory_space<vmem>>, %arg4: memref<56x56xf32, #tpu.memory_space<vmem>>, %arg5: memref<56x1xf32, #tpu.memory_space<vmem>>, %arg6: memref<1x56xf32, #tpu.memory_space<vmem>>, %arg7: memref<1x1xf32, #tpu.memory_space<vmem>>, %arg8: memref<1x128xf32, #tpu.memory_space<vmem>>) attributes {dimension_semantics = [#tpu.dimension_semantics<parallel>], iteration_bounds = array<i64: 1>, scalar_prefetch = 0 : i64, scratch_operands = 0 : i64, tpu.core_type = #tpu.core_type<tc>, window_params = [{transform_indices = @transform_0, window_bounds = array<i64: 2, 128>}, {pipeline_mode = #tpu.pipeline_mode<synchronous>, transform_indices = @transform_1, window_bounds = array<i64: 56, 2>}, {pipeline_mode = #tpu.pipeline_mode<synchronous>, transform_indices = @transform_2, window_bounds = array<i64: 56, 1>}, {pipeline_mode = #tpu.pipeline_mode<synchronous>, transform_indices = @transform_3, window_bounds = array<i64: 56, 56>}, {pipeline_mode = #tpu.pipeline_mode<synchronous>, transform_indices = @transform_4, window_bounds = array<i64: 56, 1>}, {pipeline_mode = #tpu.pipeline_mode<synchronous>, transform_indices = @transform_5, window_bounds = array<i64: 1, 56>}, {pipeline_mode = #tpu.pipeline_mode<synchronous>, transform_indices = @transform_6, window_bounds = array<i64: 1, 1>}, {transform_indices = @transform_7, window_bounds = array<i64: 1, 128>}]} {
    %c0 = arith.constant 0 : index
    %c0_0 = arith.constant 0 : index
    %0 = vector.load %arg1[%c0, %c0_0] : memref<2x128xf32, #tpu.memory_space<vmem>>, vector<1x128xf32>
    %c1 = arith.constant 1 : index
    %c0_1 = arith.constant 0 : index
    %1 = vector.load %arg1[%c1, %c0_1] : memref<2x128xf32, #tpu.memory_space<vmem>>, vector<1x128xf32>
    %c0_2 = arith.constant 0 : index
    %c0_3 = arith.constant 0 : index
    %2 = vector.load %arg2[%c0_2, %c0_3] : memref<56x2xf32, #tpu.memory_space<vmem>>, vector<56x2xf32>
    %c0_4 = arith.constant 0 : index
    %c0_5 = arith.constant 0 : index
    %3 = vector.load %arg3[%c0_4, %c0_5] : memref<56x1xf32, #tpu.memory_space<vmem>>, vector<56x1xf32>
    %4 = vector.extract_strided_slice %2 {offsets = [0, 0], sizes = [56, 1], strides = [1, 1]} : vector<56x2xf32> to vector<56x1xf32>
    %5 = vector.broadcast %4 : vector<56x1xf32> to vector<56x128xf32>
    %6 = vector.broadcast %0 : vector<1x128xf32> to vector<56x128xf32>
    %7 = arith.mulf %5, %6 : vector<56x128xf32>
    %8 = vector.extract_strided_slice %2 {offsets = [0, 1], sizes = [56, 1], strides = [1, 1]} : vector<56x2xf32> to vector<56x1xf32>
    %9 = vector.broadcast %8 : vector<56x1xf32> to vector<56x128xf32>
    %10 = vector.broadcast %1 : vector<1x128xf32> to vector<56x128xf32>
    %11 = arith.mulf %9, %10 : vector<56x128xf32>
    %12 = arith.addf %7, %11 : vector<56x128xf32>
    %13 = vector.broadcast %3 : vector<56x1xf32> to vector<56x128xf32>
    %14 = arith.addf %12, %13 : vector<56x128xf32>
    %c0_6 = arith.constant 0 : index
    %c0_7 = arith.constant 0 : index
    %15 = vector.load %arg4[%c0_6, %c0_7] : memref<56x56xf32, #tpu.memory_space<vmem>>, vector<56x56xf32>
    %c0_8 = arith.constant 0 : index
    %c0_9 = arith.constant 0 : index
    %16 = vector.load %arg5[%c0_8, %c0_9] : memref<56x1xf32, #tpu.memory_space<vmem>>, vector<56x1xf32>
    %17 = math.tanh %14 : vector<56x128xf32>
    %cst = arith.constant dense<0.000000e+00> : vector<56x128xf32>
    %18 = tpu.matmul %15, %17, %cst {dimension_numbers = #tpu.dot_dimension_numbers<[1], [0], [0], [1], [0, 0, 1, 1], [], []>} : vector<56x56xf32>, vector<56x128xf32>, vector<56x128xf32> -> vector<56x128xf32>
    %19 = vector.broadcast %16 : vector<56x1xf32> to vector<56x128xf32>
    %20 = arith.addf %18, %19 : vector<56x128xf32>
    %21 = math.tanh %20 : vector<56x128xf32>
    %cst_10 = arith.constant dense<0.000000e+00> : vector<56x128xf32>
    %22 = tpu.matmul %15, %21, %cst_10 {dimension_numbers = #tpu.dot_dimension_numbers<[1], [0], [0], [1], [0, 0, 1, 1], [], []>} : vector<56x56xf32>, vector<56x128xf32>, vector<56x128xf32> -> vector<56x128xf32>
    %23 = vector.broadcast %16 : vector<56x1xf32> to vector<56x128xf32>
    %24 = arith.addf %22, %23 : vector<56x128xf32>
    %25 = math.tanh %24 : vector<56x128xf32>
    %cst_11 = arith.constant dense<0.000000e+00> : vector<56x128xf32>
    %26 = tpu.matmul %15, %25, %cst_11 {dimension_numbers = #tpu.dot_dimension_numbers<[1], [0], [0], [1], [0, 0, 1, 1], [], []>} : vector<56x56xf32>, vector<56x128xf32>, vector<56x128xf32> -> vector<56x128xf32>
    %27 = vector.broadcast %16 : vector<56x1xf32> to vector<56x128xf32>
    %28 = arith.addf %26, %27 : vector<56x128xf32>
    %29 = math.tanh %28 : vector<56x128xf32>
    %cst_12 = arith.constant dense<0.000000e+00> : vector<56x128xf32>
    %30 = tpu.matmul %15, %29, %cst_12 {dimension_numbers = #tpu.dot_dimension_numbers<[1], [0], [0], [1], [0, 0, 1, 1], [], []>} : vector<56x56xf32>, vector<56x128xf32>, vector<56x128xf32> -> vector<56x128xf32>
    %31 = vector.broadcast %16 : vector<56x1xf32> to vector<56x128xf32>
    %32 = arith.addf %30, %31 : vector<56x128xf32>
    %33 = math.tanh %32 : vector<56x128xf32>
    %cst_13 = arith.constant dense<0.000000e+00> : vector<56x128xf32>
    %34 = tpu.matmul %15, %33, %cst_13 {dimension_numbers = #tpu.dot_dimension_numbers<[1], [0], [0], [1], [0, 0, 1, 1], [], []>} : vector<56x56xf32>, vector<56x128xf32>, vector<56x128xf32> -> vector<56x128xf32>
    %35 = vector.broadcast %16 : vector<56x1xf32> to vector<56x128xf32>
    %36 = arith.addf %34, %35 : vector<56x128xf32>
    %37 = math.tanh %36 : vector<56x128xf32>
    %cst_14 = arith.constant dense<0.000000e+00> : vector<56x128xf32>
    %38 = tpu.matmul %15, %37, %cst_14 {dimension_numbers = #tpu.dot_dimension_numbers<[1], [0], [0], [1], [0, 0, 1, 1], [], []>} : vector<56x56xf32>, vector<56x128xf32>, vector<56x128xf32> -> vector<56x128xf32>
    %39 = vector.broadcast %16 : vector<56x1xf32> to vector<56x128xf32>
    %40 = arith.addf %38, %39 : vector<56x128xf32>
    %c0_15 = arith.constant 0 : index
    %c0_16 = arith.constant 0 : index
    %41 = vector.load %arg6[%c0_15, %c0_16] : memref<1x56xf32, #tpu.memory_space<vmem>>, vector<1x56xf32>
    %42 = math.tanh %40 : vector<56x128xf32>
    %cst_17 = arith.constant dense<0.000000e+00> : vector<1x128xf32>
    %43 = tpu.matmul %41, %42, %cst_17 {dimension_numbers = #tpu.dot_dimension_numbers<[1], [0], [0], [1], [0, 0, 1, 1], [], []>} : vector<1x56xf32>, vector<56x128xf32>, vector<1x128xf32> -> vector<1x128xf32>
    %c0_18 = arith.constant 0 : index
    %c0_19 = arith.constant 0 : index
    %44 = vector.load %arg7[%c0_18, %c0_19] : memref<1x1xf32, #tpu.memory_space<vmem>>, vector<1x1xf32>
    %45 = vector.broadcast %44 : vector<1x1xf32> to vector<1x128xf32>
    %46 = arith.addf %43, %45 : vector<1x128xf32>
    %c0_20 = arith.constant 0 : index
    %c0_21 = arith.constant 0 : index
    %47 = vector.load %arg8[%c0_20, %c0_21] : memref<1x128xf32, #tpu.memory_space<vmem>>, vector<1x128xf32>
    tpu.vector_store %arg8[%c0_20, %c0_21], %46 {strides = array<i32>} : memref<1x128xf32, #tpu.memory_space<vmem>>, vector<1x128xf32>,
    return
  }
  func.func @transform_0(%arg0: i32) -> (i32, i32) {
    %c0_i32 = arith.constant 0 : i32
    %c0_i32_0 = arith.constant 0 : i32
    return %c0_i32, %arg0 : i32, i32
  }
  func.func @transform_1(%arg0: i32) -> (i32, i32) {
    %c0_i32 = arith.constant 0 : i32
    %c0_i32_0 = arith.constant 0 : i32
    %c0_i32_1 = arith.constant 0 : i32
    return %c0_i32, %c0_i32_0 : i32, i32
  }
  func.func @transform_2(%arg0: i32) -> (i32, i32) {
    %c0_i32 = arith.constant 0 : i32
    %c0_i32_0 = arith.constant 0 : i32
    %c0_i32_1 = arith.constant 0 : i32
    return %c0_i32, %c0_i32_0 : i32, i32
  }
  func.func @transform_3(%arg0: i32) -> (i32, i32) {
    %c0_i32 = arith.constant 0 : i32
    %c0_i32_0 = arith.constant 0 : i32
    %c0_i32_1 = arith.constant 0 : i32
    return %c0_i32, %c0_i32_0 : i32, i32
  }
  func.func @transform_4(%arg0: i32) -> (i32, i32) {
    %c0_i32 = arith.constant 0 : i32
    %c0_i32_0 = arith.constant 0 : i32
    %c0_i32_1 = arith.constant 0 : i32
    return %c0_i32, %c0_i32_0 : i32, i32
  }
  func.func @transform_5(%arg0: i32) -> (i32, i32) {
    %c0_i32 = arith.constant 0 : i32
    %c0_i32_0 = arith.constant 0 : i32
    %c0_i32_1 = arith.constant 0 : i32
    return %c0_i32, %c0_i32_0 : i32, i32
  }
  func.func @transform_6(%arg0: i32) -> (i32, i32) {
    %c0_i32 = arith.constant 0 : i32
    %c0_i32_0 = arith.constant 0 : i32
    %c0_i32_1 = arith.constant 0 : i32
    return %c0_i32, %c0_i32_0 : i32, i32
  }
  func.func @transform_7(%arg0: i32) -> (i32, i32) {
    %c0_i32 = arith.constant 0 : i32
    %c0_i32_0 = arith.constant 0 : i32
    return %c0_i32, %arg0 : i32, i32
  }
}

</mosaic_0001>

<bundles_post_ra>
// kernel: nn_v_forward.1
= control target key start
LH: loop header
LB: loop body
LE: loop exit
PB: predicated region body
PF: predicated region fallthrough
CT: control target
= control target key end

     0   :  { %v1527_v0 = vmov 1   ;;  %v1528_v7 = vmov 0   ;;  %v1529_v14 = vmov 0.0|0.0   ;;  %vm1530_vm0 = vmmov 0   ;;  %s1940_s1 = inlined_call_operand.vmem [shape: f32[56,2], index: 1, kind: input, shape index: {}]   ;;  %s1941_s6 = inlined_call_operand.<no memory space> [shape: f32[1,1], index: 6, kind: input, shape index: {}]   ;;  %s1942_s2 = inlined_call_operand.vmem [shape: f32[56,1], index: 2, kind: input, shape index: {}]   ;;  %s1943_s4 = inlined_call_operand.vmem [shape: f32[56,1], index: 4, kind: input, shape index: {}]   ;;  %s1944_s0 = inlined_call_operand.vmem [shape: f32[2,128], index: 0, kind: input, shape index: {}]   ;;  %s1945_s3 = inlined_call_operand.vmem [shape: f32[56,56], index: 3, kind: input, shape index: {}]   ;;  %s1946_s5 = inlined_call_operand.vmem [shape: f32[1,56], index: 5, kind: input, shape index: {}]   ;;  %s1947_s7 = inlined_call_operand.vmem [shape: f32[1,128], index: 7, kind: output, shape index: {}]  }
   0x1   :  { %1421 = vset.pattern.permute.xlu0 %v1527_v0  ;;  %1419 = vset.pattern.permute.xlu1 %v1527_v0  ;;  %v32_v1 = vld [vmem:[%s1940_s1 + $0x10] sm:$0xff]  ;;  %v30_v2 = vld [vmem:[%s1940_s1] sm:$0xff]  ;;  %v12_v3 = vstv %s1941_s6  ;;  %v31_v5 = vld [vmem:[%s1940_s1 + $0x8] sm:$0xff]  ;;  %v1531_v22 = vmov 0.0   ;;  %vm234_vm1 = vcmask 457728  }
   0x2   :  { %99 = vperm.xlu0 %1421, %v32_v1   ;;  %91 = vperm.xlu1 %1419, %v30_v2   ;;  %13 = vst [vmem:[#allocation2] sm:$0x1] %v12_v3  ;;  %v34_v4 = vld [vmem:[%s1940_s1 + $0x20] sm:$0xff]  ;;  %v33_v6 = vld [vmem:[%s1940_s1 + $0x18] sm:$0xff]  ;;  %v38_v9 = vld [vmem:[%s1942_s2 + $0x8] sm:$0xff] }
   0x3   :  { %v37_v8 = vld [vmem:[%s1942_s2] sm:$0xff]  ;;  %v40_v10 = vld [vmem:[%s1942_s2 + $0x18] sm:$0xff]  ;;  %v35_v11 = vld [vmem:[%s1940_s1 + $0x28] sm:$0xff]  ;;  %1351 = vmatprep.subr.bf16.mxu0 %v1529_v14  ;;  %1360 = vmatprep.subr.bf16.mxu1 %v1529_v14 }
   0x4   :  { %v36_v12 = vld [vmem:[%s1940_s1 + $0x30] sm:$0xff]  ;;  %v186_v15 = vld [vmem:[%s1943_s4 + $0x8] sm:$0xff]  ;;  %v188_v17 = vld [vmem:[%s1943_s4 + $0x18] sm:$0xff]  ;;  %1138 = vmatprep.mubr.msk.f32.mxu0 %vm1530_vm0, %v1531_v22  ;;  %1173 = vmatprep.mubr.msk.f32.mxu1 %vm1530_vm0, %v1531_v22 }
   0x5   :  { %v43_v13 = vld [vmem:[%s1942_s2 + $0x30] sm:$0xff]  ;;  %v41_v18 = vld [vmem:[%s1942_s2 + $0x20] sm:$0xff]  ;;  %v190_v19 = vld [vmem:[%s1943_s4 + $0x28] sm:$0xff] }
   0x6   :  { %107 = vperm.xlu0 %1421, %v34_v4   ;;  %95 = vperm.xlu1 %1419, %v31_v5   ;;  %v39_v16 = vld [vmem:[%s1942_s2 + $0x10] sm:$0xff]  ;;  %v42_v20 = vld [vmem:[%s1942_s2 + $0x28] sm:$0xff]  ;;  %v185_v23 = vld [vmem:[%s1943_s4] sm:$0xff] }
   0x7   :  { %v187_v24 = vld [vmem:[%s1943_s4 + $0x10] sm:$0xff]  ;;  %v189_v25 = vld [vmem:[%s1943_s4 + $0x20] sm:$0xff] }
   0x8   :  { %v191_v26 = vld [vmem:[%s1943_s4 + $0x30] sm:$0xff]  ;;  %v987_v33 = vld [vmem:[%s1944_s0] ss:$0 sm:$0xff]  ;;  %v988_v34 = vld [vmem:[%s1944_s0 + $0x1] ss:$0 sm:$0xff] }
   0x9   :  { %v899_v21 = vld [vmem:[#allocation2] sm:$0x1] }
   0xa   :  { %1424 = vset.pattern.permute.xlu0 %v1528_v7  ;;  %1420 = vset.pattern.permute.xlu1 %v1528_v7 }
   0xb   :  { %46 = vperm.xlu0 %1424, %v30_v2   ;;  %61 = vperm.xlu1 %1420, %v33_v6  }
   0xf   :  { %51 = vperm.xlu0 %1424, %v31_v5   ;;  %1422 = vset.pattern.permute.xlu1 %v1527_v0 }
  0x10   :  { %103 = vperm.xlu1 %1422, %v33_v6  }
  0x13   :  { %56 = vperm.xlu0 %1424, %v32_v1  }
  0x14   :  { %1423 = vset.pattern.permute.xlu1 %v1528_v7 }
  0x15   :  { %138 = vperm.xlu1 %1423, %v37_v8  }
  0x17   :  { %143 = vperm.xlu0 %1424, %v38_v9  }
  0x19   :  { %66 = vperm.xlu1 %1423, %v34_v4  }
  0x1b   :  { %153 = vperm.xlu0 %1424, %v40_v10  }
  0x1d   :  { %71 = vperm.xlu1 %1423, %v35_v11  }
  0x1f   :  { %76 = vperm.xlu0 %1424, %v36_v12  }
  0x21   :  { %1425 = vset.pattern.permute.xlu1 %v1527_v0 }
  0x22   :  { %111 = vperm.xlu1 %1425, %v35_v11  }
  0x23   :  { %168 = vperm.xlu0 %1424, %v43_v13  }
  0x26   :  { %1426 = vset.pattern.permute.xlu1 %v1528_v7 }
  0x27   :  { %206 = vperm.xlu0 %1424, %v186_v15   ;;  %148 = vperm.xlu1 %1426, %v39_v16  }
  0x2b   :  { %216 = vperm.xlu0 %1424, %v188_v17   ;;  %158 = vperm.xlu1 %1426, %v41_v18  }
  0x2f   :  { %226 = vperm.xlu0 %1424, %v190_v19   ;;  %163 = vperm.xlu1 %1426, %v42_v20  }
  0x33   :  { %902 = vperm.xlu0 %1424, %v899_v21   ;;  %1427 = vset.pattern.permute.xlu1 %v1527_v0 }
  0x34   :  { %115 = vperm.xlu1 %1427, %v36_v12  }
  0x38   :  { %1428 = vset.pattern.permute.xlu1 %v1528_v7 }
  0x39   :  { %201 = vperm.xlu1 %1428, %v185_v23  }
  0x3d   :  { %211 = vperm.xlu1 %1428, %v187_v24  }
  0x41   :  { %221 = vperm.xlu1 %1428, %v189_v25   ;;  %v1656_v25 = vld [vmem:[%s1945_s3] sm:$0xff] }
  0x45   :  { %231 = vperm.xlu1 %1428, %v191_v26  }
  0x81   :  { %v92_v27 = vpop.permute.xlu1 %91  ;;  %v100_v28 = vpop.permute.xlu0 %99 }
  0x82   :  { %v122_v38 = vmul.f32 %v988_v34, %v92_v27  ;;  %v124_v52 = vmul.f32 %v988_v34, %v100_v28  ;;  %v1666_v27 = vld [vmem:[%s1945_s3 + $0x8] sm:$0xff]  ;;  %v1675_v28 = vld [vmem:[%s1945_s3 + $0x10] sm:$0xff] }
  0x85   :  { %v96_v29 = vpop.permute.xlu1 %95  ;;  %v108_v30 = vpop.permute.xlu0 %107 }
  0x86   :  { %v123_v41 = vmul.f32 %v988_v34, %v96_v29  ;;  %v126_v1 = vmul.f32 %v988_v34, %v108_v30  ;;  %v1684_v29 = vld [vmem:[%s1945_s3 + $0x18] sm:$0xff]  ;;  %v1693_v30 = vld [vmem:[%s1945_s3 + $0x20] sm:$0xff] }
  0x8a   :  { %v47_v31 = vpop.permute.xlu0 %46  ;;  %v62_v32 = vpop.permute.xlu1 %61 }
  0x8b   :  { %v83_v36 = vmul.f32 %v987_v33, %v47_v31  ;;  %v86_v51 = vmul.f32 %v987_v33, %v62_v32  ;;  %v1702_v31 = vld [vmem:[%s1945_s3 + $0x28] sm:$0xff]  ;;  %v1711_v32 = vld [vmem:[%s1945_s3 + $0x30] sm:$0xff] }
  0x8d   :  { %v129_v42 = vadd.f32 %v122_v38, %v83_v36 }
  0x8e   :  { %v52_v35 = vpop.permute.xlu0 %51 }
  0x8f   :  { %v104_v37 = vpop.permute.xlu1 %103  ;;  %v84_v39 = vmul.f32 %v987_v33, %v52_v35 }
  0x90   :  { %v125_v50 = vmul.f32 %v988_v34, %v104_v37 }
  0x91   :  { %v130_v45 = vadd.f32 %v123_v41, %v84_v39 }
  0x92   :  { %v57_v40 = vpop.permute.xlu0 %56  ;;  %v132_v57 = vadd.f32 %v125_v50, %v86_v51 }
  0x93   :  { %v85_v53 = vmul.f32 %v987_v33, %v57_v40 }
  0x94   :  { %v139_v43 = vpop.permute.xlu1 %138 }
  0x95   :  { %v171_v44 = vadd.f32 %v139_v43, %v129_v42  ;;  %v131_v61 = vadd.f32 %v124_v52, %v85_v53 }
  0x96   :  { %v144_v46 = vpop.permute.xlu0 %143 }
  0x97   :  { %v172_v47 = vadd.f32 %v144_v46, %v130_v45  ;;  %1429 = vtanh.f32 %v171_v44 }
  0x98   :  { %v67_v48 = vpop.permute.xlu1 %66 }
  0x99   :  { %1431 = vtanh.f32 %v172_v47  ;;  %v87_v62 = vmul.f32 %v987_v33, %v67_v48 }
  0x9a   :  { %v154_v54 = vpop.permute.xlu0 %153 }
  0x9b   :  { %v174_v59 = vadd.f32 %v154_v54, %v132_v57  ;;  %v133_v4 = vadd.f32 %v126_v1, %v87_v62 }
  0x9c   :  { %v72_v49 = vpop.permute.xlu1 %71 }
  0x9d   :  { %1433 = vtanh.f32 %v174_v59  ;;  %v88_v5 = vmul.f32 %v987_v33, %v72_v49 }
  0x9e   :  { %v77_v10 = vpop.permute.xlu0 %76 }
  0x9f   :  { %v89_v15 = vmul.f32 %v987_v33, %v77_v10 }
  0xa1   :  { %v112_v55 = vpop.permute.xlu1 %111  ;;  %v1430_v56 = vpop.eup %1429 }
  0xa2   :  { %v127_v2 = vmul.f32 %v988_v34, %v112_v55  ;;  %v169_v19 = vpop.permute.xlu0 %168 }
  0xa3   :  { %v1432_v58 = vpop.eup %1431 }
  0xa4   :  { %v1352_v60 = vpack.c.bf16 %v1432_v58, %v1430_v56  ;;  %v134_v7 = vadd.f32 %v127_v2, %v88_v5 }
  0xa6   :  { %v149_v63 = vpop.permute.xlu1 %148  ;;  %1353 = vmatpush3.bf16.msra.mxu0 %v1352_v60  ;;  %v1720_v37 = vpop.permute.xlu0 %206 }
  0xa7   :  { %v173_v0 = vadd.f32 %v149_v63, %v131_v61  ;;  %1354 = vmatprep.subr.bf16.mxu0 %v1529_v14  ;;  %v1434_v11 = vpop.eup %1433 }
  0xa9   :  { %1435 = vtanh.f32 %v173_v0 }
  0xaa   :  { %v159_v3 = vpop.permute.xlu1 %158  ;;  %v1726_v45 = vpop.permute.xlu0 %216 }
  0xab   :  { %v175_v6 = vadd.f32 %v159_v3, %v133_v4 }
  0xad   :  { %1437 = vtanh.f32 %v175_v6 }
  0xae   :  { %v164_v8 = vpop.permute.xlu1 %163  ;;  %v1732_v56 = vpop.permute.xlu0 %226 }
  0xaf   :  { %v176_v9 = vadd.f32 %v164_v8, %v134_v7 }
  0xb1   :  { %1439 = vtanh.f32 %v176_v9 }
  0xb3   :  { %v1436_v12 = vpop.eup %1435  ;;  %v116_v13 = vpop.permute.xlu1 %115 }
  0xb4   :  { %v128_v16 = vmul.f32 %v988_v34, %v116_v13  ;;  %v1355_v17 = vpack.c.bf16 %v1434_v11, %v1436_v12 }
  0xb6   :  { %v135_v18 = vadd.f32 %v128_v16, %v89_v15  ;;  %1356 = vmatpush3.bf16.msra.mxu0 %v1355_v17 }
  0xb7   :  { %1357 = vmatprep.subr.bf16.mxu0 %v1529_v14  ;;  %v1438_v21 = vpop.eup %1437 }
  0xb8   :  { %v177_v20 = vadd.f32 %v169_v19, %v135_v18  ;;  %v1717_v33 = vpop.permute.xlu1 %201 }
  0xba   :  { %1441 = vtanh.f32 %v177_v20 }
  0xbb   :  { %v1440_v23 = vpop.eup %1439 }
  0xbc   :  { %v1358_v24 = vpack.c.bf16 %v1440_v23, %v1438_v21  ;;  %v1723_v42 = vpop.permute.xlu1 %211 }
  0xbe   :  { %1359 = vmatpush3.bf16.msra.mxu0 %v1358_v24 }
  0xbf   :  { %1136 = vmatprep.subr.mxu0 %v1531_v22 }
  0xc0   :  { %v1729_v52 = vpop.permute.xlu1 %221 }
  0xc4   :  { %v1442_v26 = vpop.eup %1441  ;;  %v1736_v61 = vpop.permute.xlu1 %231 }
  0xc5   :  { %1137 = vmatpush3.msra.mxu0 %v1442_v26 }
  0xc6   :  { %1139 = vmatmul.mubr.msk.f32.vlgmr.msra.gmra.mrb[0].mxu0 %vm234_vm1, %v1656_v25  ;;  %1369 = vmatprep.subr.bf16.mxu0 %v1529_v14 }
  0xc7   :  { %1141 = vmatprep.mubr.msk.f32.mxu0 %vm1530_vm0, %v1531_v22 }
  0xca   :  { %1142 = vmatmul.mubr.msk.f32.gmra.mrb[2].mxu0 %vm234_vm1, %v1666_v27 }
  0xcb   :  { %1144 = vmatprep.mubr.msk.f32.mxu0 %vm1530_vm0, %v1531_v22 }
  0xce   :  { %1145 = vmatmul.mubr.msk.f32.gmra.mrb[4].mxu0 %vm234_vm1, %v1675_v28 }
  0xcf   :  { %1147 = vmatprep.mubr.msk.f32.mxu0 %vm1530_vm0, %v1531_v22 }
  0xd2   :  { %1148 = vmatmul.mubr.msk.f32.gmra.mrb[6].mxu0 %vm234_vm1, %v1684_v29 }
  0xd3   :  { %1150 = vmatprep.mubr.msk.f32.mxu0 %vm1530_vm0, %v1531_v22 }
  0xd6   :  { %1151 = vmatmul.mubr.msk.f32.gmra.mrb[8].mxu0 %vm234_vm1, %v1693_v30 }
  0xd7   :  { %1153 = vmatprep.mubr.msk.f32.mxu0 %vm1530_vm0, %v1531_v22 }
  0xda   :  { %1154 = vmatmul.mubr.msk.f32.gmra.mrb[10].mxu0 %vm234_vm1, %v1702_v31 }
  0xdb   :  { %1156 = vmatprep.mubr.msk.f32.mxu0 %vm1530_vm0, %v1531_v22 }
  0xde   :  { %1157 = vmatmul.mubr.msk.f32.gmra.mrb[12].mxu0 %vm234_vm1, %v1711_v32 }
  0xdf   :  { %1208 = vmatprep.mubr.msk.f32.mxu0 %vm1530_vm0, %v1531_v22 }
 0x199   :  { %v322_v34 = vpop.f32.mrb[0].mxu0 }
 0x19a   :  { %v1140_v35 = vpop.f32.mrb[1].mxu0  ;;  %v323_v36 = vadd.f32 %v322_v34, %v1717_v33 }
 0x19c   :  { %1443 = vtanh.f32 %v323_v36 }
 0x19d   :  { %v327_v38 = vpop.f32.mrb[2].mxu0 }
 0x19e   :  { %v328_v39 = vadd.f32 %v327_v38, %v1720_v37  ;;  %v1143_v40 = vpop.f32.mrb[3].mxu0 }
 0x1a0   :  { %1445 = vtanh.f32 %v328_v39 }
 0x1a1   :  { %v332_v41 = vpop.f32.mrb[4].mxu0 }
 0x1a2   :  { %v1146_v43 = vpop.f32.mrb[5].mxu0  ;;  %v333_v44 = vadd.f32 %v332_v41, %v1723_v42 }
 0x1a4   :  { %1447 = vtanh.f32 %v333_v44 }
 0x1a5   :  { %v337_v46 = vpop.f32.mrb[6].mxu0 }
 0x1a6   :  { %v338_v47 = vadd.f32 %v337_v46, %v1726_v45  ;;  %v1149_v48 = vpop.f32.mrb[7].mxu0  ;;  %v1444_v49 = vpop.eup %1443 }
 0x1a8   :  { %1449 = vtanh.f32 %v338_v47 }
 0x1a9   :  { %v342_v50 = vpop.f32.mrb[8].mxu0 }
 0x1aa   :  { %v1446_v51 = vpop.eup %1445  ;;  %v1152_v53 = vpop.f32.mrb[9].mxu0  ;;  %v343_v54 = vadd.f32 %v342_v50, %v1729_v52 }
 0x1ab   :  { %v1361_v55 = vpack.c.bf16 %v1446_v51, %v1444_v49 }
 0x1ac   :  { %1451 = vtanh.f32 %v343_v54 }
 0x1ad   :  { %v347_v57 = vpop.f32.mrb[10].mxu0  ;;  %1362 = vmatpush3.bf16.msra.mxu1 %v1361_v55 }
 0x1ae   :  { %v348_v58 = vadd.f32 %v347_v57, %v1732_v56  ;;  %v1155_v59 = vpop.f32.mrb[11].mxu0  ;;  %1363 = vmatprep.subr.bf16.mxu1 %v1529_v14  ;;  %v1448_v60 = vpop.eup %1447 }
 0x1b0   :  { %1453 = vtanh.f32 %v348_v58 }
 0x1b1   :  { %v352_v62 = vpop.f32.mrb[12].mxu0 }
 0x1b2   :  { %v1450_v63 = vpop.eup %1449  ;;  %v353_v0 = vadd.f32 %v352_v62, %v1736_v61  ;;  %v1158_v1 = vpop.f32.mrb[13].mxu0 }
 0x1b3   :  { %v1364_v2 = vpack.c.bf16 %v1450_v63, %v1448_v60 }
 0x1b4   :  { %1455 = vtanh.f32 %v353_v0 }
 0x1b5   :  { %1365 = vmatpush3.bf16.msra.mxu1 %v1364_v2 }
 0x1b6   :  { %1366 = vmatprep.subr.bf16.mxu1 %v1529_v14  ;;  %v1452_v3 = vpop.eup %1451 }
 0x1ba   :  { %v1454_v4 = vpop.eup %1453 }
 0x1bb   :  { %v1367_v5 = vpack.c.bf16 %v1454_v4, %v1452_v3 }
 0x1bd   :  { %1368 = vmatpush3.bf16.msra.mxu1 %v1367_v5 }
 0x1be   :  { %1171 = vmatprep.subr.mxu1 %v1531_v22  ;;  %v1456_v6 = vpop.eup %1455 }
 0x1c1   :  { %1172 = vmatpush3.msra.mxu1 %v1456_v6 }
 0x1c2   :  { %1174 = vmatmul.mubr.msk.f32.vlgmr.msra.gmra.mrb[0].mxu1 %vm234_vm1, %v1656_v25  ;;  %1378 = vmatprep.subr.bf16.mxu1 %v1529_v14 }
 0x1c3   :  { %1176 = vmatprep.mubr.msk.f32.mxu1 %vm1530_vm0, %v1531_v22 }
 0x1c6   :  { %1177 = vmatmul.mubr.msk.f32.gmra.mrb[2].mxu1 %vm234_vm1, %v1666_v27 }
 0x1c7   :  { %1179 = vmatprep.mubr.msk.f32.mxu1 %vm1530_vm0, %v1531_v22 }
 0x1ca   :  { %1180 = vmatmul.mubr.msk.f32.gmra.mrb[4].mxu1 %vm234_vm1, %v1675_v28 }
 0x1cb   :  { %1182 = vmatprep.mubr.msk.f32.mxu1 %vm1530_vm0, %v1531_v22 }
 0x1ce   :  { %1183 = vmatmul.mubr.msk.f32.gmra.mrb[6].mxu1 %vm234_vm1, %v1684_v29 }
 0x1cf   :  { %1185 = vmatprep.mubr.msk.f32.mxu1 %vm1530_vm0, %v1531_v22 }
 0x1d2   :  { %1186 = vmatmul.mubr.msk.f32.gmra.mrb[8].mxu1 %vm234_vm1, %v1693_v30 }
 0x1d3   :  { %1188 = vmatprep.mubr.msk.f32.mxu1 %vm1530_vm0, %v1531_v22 }
 0x1d6   :  { %1189 = vmatmul.mubr.msk.f32.gmra.mrb[10].mxu1 %vm234_vm1, %v1702_v31 }
 0x1d7   :  { %1191 = vmatprep.mubr.msk.f32.mxu1 %vm1530_vm0, %v1531_v22 }
 0x1da   :  { %1192 = vmatmul.mubr.msk.f32.gmra.mrb[12].mxu1 %vm234_vm1, %v1711_v32 }
 0x1db   :  { %1243 = vmatprep.mubr.msk.f32.mxu1 %vm1530_vm0, %v1531_v22 }
 0x295   :  { %v429_v7 = vpop.f32.mrb[0].mxu1 }
 0x296   :  { %v1175_v8 = vpop.f32.mrb[1].mxu1  ;;  %v430_v9 = vadd.f32 %v429_v7, %v1717_v33 }
 0x298   :  { %1457 = vtanh.f32 %v430_v9 }
 0x299   :  { %v434_v10 = vpop.f32.mrb[2].mxu1 }
 0x29a   :  { %v435_v11 = vadd.f32 %v434_v10, %v1720_v37  ;;  %v1178_v12 = vpop.f32.mrb[3].mxu1 }
 0x29c   :  { %1459 = vtanh.f32 %v435_v11 }
 0x29d   :  { %v439_v13 = vpop.f32.mrb[4].mxu1 }
 0x29e   :  { %v1181_v15 = vpop.f32.mrb[5].mxu1  ;;  %v440_v16 = vadd.f32 %v439_v13, %v1723_v42 }
 0x2a0   :  { %1461 = vtanh.f32 %v440_v16 }
 0x2a1   :  { %v444_v17 = vpop.f32.mrb[6].mxu1 }
 0x2a2   :  { %v445_v18 = vadd.f32 %v444_v17, %v1726_v45  ;;  %v1184_v19 = vpop.f32.mrb[7].mxu1  ;;  %v1458_v20 = vpop.eup %1457 }
 0x2a4   :  { %1463 = vtanh.f32 %v445_v18 }
 0x2a5   :  { %v449_v21 = vpop.f32.mrb[8].mxu1 }
 0x2a6   :  { %v1460_v23 = vpop.eup %1459  ;;  %v1187_v24 = vpop.f32.mrb[9].mxu1  ;;  %v450_v26 = vadd.f32 %v449_v21, %v1729_v52 }
 0x2a7   :  { %v1370_v34 = vpack.c.bf16 %v1460_v23, %v1458_v20 }
 0x2a8   :  { %1465 = vtanh.f32 %v450_v26 }
 0x2a9   :  { %v454_v35 = vpop.f32.mrb[10].mxu1  ;;  %1371 = vmatpush3.bf16.msra.mxu0 %v1370_v34 }
 0x2aa   :  { %v455_v36 = vadd.f32 %v454_v35, %v1732_v56  ;;  %v1190_v38 = vpop.f32.mrb[11].mxu1  ;;  %1372 = vmatprep.subr.bf16.mxu0 %v1529_v14  ;;  %v1462_v39 = vpop.eup %1461 }
 0x2ac   :  { %1467 = vtanh.f32 %v455_v36 }
 0x2ad   :  { %v459_v40 = vpop.f32.mrb[12].mxu1 }
 0x2ae   :  { %v1464_v41 = vpop.eup %1463  ;;  %v460_v43 = vadd.f32 %v459_v40, %v1736_v61  ;;  %v1193_v44 = vpop.f32.mrb[13].mxu1 }
 0x2af   :  { %v1373_v46 = vpack.c.bf16 %v1464_v41, %v1462_v39 }
 0x2b0   :  { %1469 = vtanh.f32 %v460_v43 }
 0x2b1   :  { %1374 = vmatpush3.bf16.msra.mxu0 %v1373_v46 }
 0x2b2   :  { %1375 = vmatprep.subr.bf16.mxu0 %v1529_v14  ;;  %v1466_v47 = vpop.eup %1465 }
 0x2b6   :  { %v1468_v48 = vpop.eup %1467 }
 0x2b7   :  { %v1376_v49 = vpack.c.bf16 %v1468_v48, %v1466_v47 }
 0x2b9   :  { %1377 = vmatpush3.bf16.msra.mxu0 %v1376_v49 }
 0x2ba   :  { %1206 = vmatprep.subr.mxu0 %v1531_v22  ;;  %v1470_v50 = vpop.eup %1469 }
 0x2bd   :  { %1207 = vmatpush3.msra.mxu0 %v1470_v50 }
 0x2be   :  { %1209 = vmatmul.mubr.msk.f32.vlgmr.msra.gmra.mrb[14].mxu0 %vm234_vm1, %v1656_v25  ;;  %1387 = vmatprep.subr.bf16.mxu0 %v1529_v14 }
 0x2bf   :  { %1211 = vmatprep.mubr.msk.f32.mxu0 %vm1530_vm0, %v1531_v22 }
 0x2c2   :  { %1212 = vmatmul.mubr.msk.f32.gmra.mrb[16].mxu0 %vm234_vm1, %v1666_v27 }
 0x2c3   :  { %1214 = vmatprep.mubr.msk.f32.mxu0 %vm1530_vm0, %v1531_v22 }
 0x2c6   :  { %1215 = vmatmul.mubr.msk.f32.gmra.mrb[18].mxu0 %vm234_vm1, %v1675_v28 }
 0x2c7   :  { %1217 = vmatprep.mubr.msk.f32.mxu0 %vm1530_vm0, %v1531_v22 }
 0x2ca   :  { %1218 = vmatmul.mubr.msk.f32.gmra.mrb[20].mxu0 %vm234_vm1, %v1684_v29 }
 0x2cb   :  { %1220 = vmatprep.mubr.msk.f32.mxu0 %vm1530_vm0, %v1531_v22 }
 0x2ce   :  { %1221 = vmatmul.mubr.msk.f32.gmra.mrb[22].mxu0 %vm234_vm1, %v1693_v30 }
 0x2cf   :  { %1223 = vmatprep.mubr.msk.f32.mxu0 %vm1530_vm0, %v1531_v22 }
 0x2d2   :  { %1224 = vmatmul.mubr.msk.f32.gmra.mrb[24].mxu0 %vm234_vm1, %v1702_v31 }
 0x2d3   :  { %1226 = vmatprep.mubr.msk.f32.mxu0 %vm1530_vm0, %v1531_v22 }
 0x2d6   :  { %1227 = vmatmul.mubr.msk.f32.gmra.mrb[26].mxu0 %vm234_vm1, %v1711_v32 }
 0x2d7   :  { %1278 = vmatprep.mubr.msk.f32.mxu0 %vm1530_vm0, %v1531_v22 }
 0x391   :  { %v536_v51 = vpop.f32.mrb[14].mxu0 }
 0x392   :  { %v1210_v53 = vpop.f32.mrb[15].mxu0  ;;  %v537_v54 = vadd.f32 %v536_v51, %v1717_v33 }
 0x394   :  { %1471 = vtanh.f32 %v537_v54 }
 0x395   :  { %v541_v55 = vpop.f32.mrb[16].mxu0 }
 0x396   :  { %v542_v57 = vadd.f32 %v541_v55, %v1720_v37  ;;  %v1213_v58 = vpop.f32.mrb[17].mxu0 }
 0x398   :  { %1473 = vtanh.f32 %v542_v57 }
 0x399   :  { %v546_v59 = vpop.f32.mrb[18].mxu0 }
 0x39a   :  { %v1216_v60 = vpop.f32.mrb[19].mxu0  ;;  %v547_v62 = vadd.f32 %v546_v59, %v1723_v42 }
 0x39c   :  { %1475 = vtanh.f32 %v547_v62 }
 0x39d   :  { %v551_v63 = vpop.f32.mrb[20].mxu0 }
 0x39e   :  { %v552_v0 = vadd.f32 %v551_v63, %v1726_v45  ;;  %v1219_v1 = vpop.f32.mrb[21].mxu0  ;;  %v1472_v2 = vpop.eup %1471 }
 0x3a0   :  { %1477 = vtanh.f32 %v552_v0 }
 0x3a1   :  { %v556_v3 = vpop.f32.mrb[22].mxu0 }
 0x3a2   :  { %v1474_v4 = vpop.eup %1473  ;;  %v1222_v5 = vpop.f32.mrb[23].mxu0  ;;  %v557_v6 = vadd.f32 %v556_v3, %v1729_v52 }
 0x3a3   :  { %v1379_v7 = vpack.c.bf16 %v1474_v4, %v1472_v2 }
 0x3a4   :  { %1479 = vtanh.f32 %v557_v6 }
 0x3a5   :  { %v561_v8 = vpop.f32.mrb[24].mxu0  ;;  %1380 = vmatpush3.bf16.msra.mxu1 %v1379_v7 }
 0x3a6   :  { %v562_v9 = vadd.f32 %v561_v8, %v1732_v56  ;;  %v1225_v10 = vpop.f32.mrb[25].mxu0  ;;  %1381 = vmatprep.subr.bf16.mxu1 %v1529_v14  ;;  %v1476_v11 = vpop.eup %1475 }
 0x3a8   :  { %1481 = vtanh.f32 %v562_v9 }
 0x3a9   :  { %v566_v12 = vpop.f32.mrb[26].mxu0 }
 0x3aa   :  { %v1478_v13 = vpop.eup %1477  ;;  %v567_v15 = vadd.f32 %v566_v12, %v1736_v61  ;;  %v1228_v16 = vpop.f32.mrb[27].mxu0 }
 0x3ab   :  { %v1382_v17 = vpack.c.bf16 %v1478_v13, %v1476_v11 }
 0x3ac   :  { %1483 = vtanh.f32 %v567_v15 }
 0x3ad   :  { %1383 = vmatpush3.bf16.msra.mxu1 %v1382_v17 }
 0x3ae   :  { %1384 = vmatprep.subr.bf16.mxu1 %v1529_v14  ;;  %v1480_v18 = vpop.eup %1479 }
 0x3b2   :  { %v1482_v19 = vpop.eup %1481 }
 0x3b3   :  { %v1385_v20 = vpack.c.bf16 %v1482_v19, %v1480_v18 }
 0x3b5   :  { %1386 = vmatpush3.bf16.msra.mxu1 %v1385_v20 }
 0x3b6   :  { %1241 = vmatprep.subr.mxu1 %v1531_v22  ;;  %v1484_v21 = vpop.eup %1483 }
 0x3b9   :  { %1242 = vmatpush3.msra.mxu1 %v1484_v21 }
 0x3ba   :  { %1244 = vmatmul.mubr.msk.f32.vlgmr.msra.gmra.mrb[14].mxu1 %vm234_vm1, %v1656_v25  ;;  %1396 = vmatprep.subr.bf16.mxu1 %v1529_v14 }
 0x3bb   :  { %1246 = vmatprep.mubr.msk.f32.mxu1 %vm1530_vm0, %v1531_v22 }
 0x3be   :  { %1247 = vmatmul.mubr.msk.f32.gmra.mrb[16].mxu1 %vm234_vm1, %v1666_v27 }
 0x3bf   :  { %1249 = vmatprep.mubr.msk.f32.mxu1 %vm1530_vm0, %v1531_v22 }
 0x3c2   :  { %1250 = vmatmul.mubr.msk.f32.gmra.mrb[18].mxu1 %vm234_vm1, %v1675_v28 }
 0x3c3   :  { %1252 = vmatprep.mubr.msk.f32.mxu1 %vm1530_vm0, %v1531_v22 }
 0x3c6   :  { %1253 = vmatmul.mubr.msk.f32.gmra.mrb[20].mxu1 %vm234_vm1, %v1684_v29 }
 0x3c7   :  { %1255 = vmatprep.mubr.msk.f32.mxu1 %vm1530_vm0, %v1531_v22 }
 0x3ca   :  { %1256 = vmatmul.mubr.msk.f32.gmra.mrb[22].mxu1 %vm234_vm1, %v1693_v30 }
 0x3cb   :  { %1258 = vmatprep.mubr.msk.f32.mxu1 %vm1530_vm0, %v1531_v22 }
 0x3ce   :  { %1259 = vmatmul.mubr.msk.f32.gmra.mrb[24].mxu1 %vm234_vm1, %v1702_v31 }
 0x3cf   :  { %1261 = vmatprep.mubr.msk.f32.mxu1 %vm1530_vm0, %v1531_v22 }
 0x3d2   :  { %1262 = vmatmul.mubr.msk.f32.gmra.mrb[26].mxu1 %vm234_vm1, %v1711_v32 }
 0x3d3   :  { %1313 = vmatprep.mubr.msk.f32.mxu1 %vm1530_vm0, %v1531_v22 }
 0x48d   :  { %v643_v23 = vpop.f32.mrb[14].mxu1 }
 0x48e   :  { %v1245_v24 = vpop.f32.mrb[15].mxu1  ;;  %v644_v26 = vadd.f32 %v643_v23, %v1717_v33 }
 0x490   :  { %1485 = vtanh.f32 %v644_v26 }
 0x491   :  { %v648_v34 = vpop.f32.mrb[16].mxu1 }
 0x492   :  { %v649_v35 = vadd.f32 %v648_v34, %v1720_v37  ;;  %v1248_v36 = vpop.f32.mrb[17].mxu1 }
 0x494   :  { %1487 = vtanh.f32 %v649_v35 }
 0x495   :  { %v653_v38 = vpop.f32.mrb[18].mxu1 }
 0x496   :  { %v1251_v39 = vpop.f32.mrb[19].mxu1  ;;  %v654_v40 = vadd.f32 %v653_v38, %v1723_v42 }
 0x498   :  { %1489 = vtanh.f32 %v654_v40 }
 0x499   :  { %v658_v41 = vpop.f32.mrb[20].mxu1 }
 0x49a   :  { %v659_v43 = vadd.f32 %v658_v41, %v1726_v45  ;;  %v1254_v44 = vpop.f32.mrb[21].mxu1  ;;  %v1486_v46 = vpop.eup %1485 }
 0x49c   :  { %1491 = vtanh.f32 %v659_v43 }
 0x49d   :  { %v663_v47 = vpop.f32.mrb[22].mxu1 }
 0x49e   :  { %v1488_v48 = vpop.eup %1487  ;;  %v1257_v49 = vpop.f32.mrb[23].mxu1  ;;  %v664_v50 = vadd.f32 %v663_v47, %v1729_v52 }
 0x49f   :  { %v1388_v51 = vpack.c.bf16 %v1488_v48, %v1486_v46 }
 0x4a0   :  { %1493 = vtanh.f32 %v664_v50 }
 0x4a1   :  { %v668_v53 = vpop.f32.mrb[24].mxu1  ;;  %1389 = vmatpush3.bf16.msra.mxu0 %v1388_v51 }
 0x4a2   :  { %v669_v54 = vadd.f32 %v668_v53, %v1732_v56  ;;  %v1260_v55 = vpop.f32.mrb[25].mxu1  ;;  %1390 = vmatprep.subr.bf16.mxu0 %v1529_v14  ;;  %v1490_v57 = vpop.eup %1489 }
 0x4a4   :  { %1495 = vtanh.f32 %v669_v54 }
 0x4a5   :  { %v673_v58 = vpop.f32.mrb[26].mxu1 }
 0x4a6   :  { %v1492_v59 = vpop.eup %1491  ;;  %v674_v60 = vadd.f32 %v673_v58, %v1736_v61  ;;  %v1263_v62 = vpop.f32.mrb[27].mxu1 }
 0x4a7   :  { %v1391_v63 = vpack.c.bf16 %v1492_v59, %v1490_v57 }
 0x4a8   :  { %1497 = vtanh.f32 %v674_v60 }
 0x4a9   :  { %1392 = vmatpush3.bf16.msra.mxu0 %v1391_v63 }
 0x4aa   :  { %1393 = vmatprep.subr.bf16.mxu0 %v1529_v14  ;;  %v1494_v0 = vpop.eup %1493 }
 0x4ae   :  { %v1496_v1 = vpop.eup %1495 }
 0x4af   :  { %v1394_v2 = vpack.c.bf16 %v1496_v1, %v1494_v0 }
 0x4b1   :  { %1395 = vmatpush3.bf16.msra.mxu0 %v1394_v2 }
 0x4b2   :  { %1276 = vmatprep.subr.mxu0 %v1531_v22  ;;  %v1498_v3 = vpop.eup %1497 }
 0x4b5   :  { %1277 = vmatpush3.msra.mxu0 %v1498_v3 }
 0x4b6   :  { %1279 = vmatmul.mubr.msk.f32.vlgmr.msra.gmra.mrb[28].mxu0 %vm234_vm1, %v1656_v25  ;;  %1405 = vmatprep.subr.bf16.mxu0 %v1529_v14 }
 0x4b7   :  { %1281 = vmatprep.mubr.msk.f32.mxu0 %vm1530_vm0, %v1531_v22 }
 0x4ba   :  { %1282 = vmatmul.mubr.msk.f32.gmra.mrb[30].mxu0 %vm234_vm1, %v1666_v27 }
 0x4bb   :  { %1284 = vmatprep.mubr.msk.f32.mxu0 %vm1530_vm0, %v1531_v22 }
 0x4be   :  { %1285 = vmatmul.mubr.msk.f32.gmra.mrb[32].mxu0 %vm234_vm1, %v1675_v28 }
 0x4bf   :  { %1287 = vmatprep.mubr.msk.f32.mxu0 %vm1530_vm0, %v1531_v22 }
 0x4c2   :  { %1288 = vmatmul.mubr.msk.f32.gmra.mrb[34].mxu0 %vm234_vm1, %v1684_v29 }
 0x4c3   :  { %1290 = vmatprep.mubr.msk.f32.mxu0 %vm1530_vm0, %v1531_v22 }
 0x4c6   :  { %1291 = vmatmul.mubr.msk.f32.gmra.mrb[36].mxu0 %vm234_vm1, %v1693_v30 }
 0x4c7   :  { %1293 = vmatprep.mubr.msk.f32.mxu0 %vm1530_vm0, %v1531_v22 }
 0x4ca   :  { %1294 = vmatmul.mubr.msk.f32.gmra.mrb[38].mxu0 %vm234_vm1, %v1702_v31 }
 0x4cb   :  { %1296 = vmatprep.mubr.msk.f32.mxu0 %vm1530_vm0, %v1531_v22 }
 0x4ce   :  { %1297 = vmatmul.mubr.msk.f32.gmra.mrb[40].mxu0 %vm234_vm1, %v1711_v32 }
 0x4cf   :  { %1348 = vmatprep.mubr.msk.f32.mxu0 %vm1530_vm0, %v1531_v22 }
 0x589   :  { %v750_v4 = vpop.f32.mrb[28].mxu0 }
 0x58a   :  { %v1280_v5 = vpop.f32.mrb[29].mxu0  ;;  %v751_v6 = vadd.f32 %v750_v4, %v1717_v33 }
 0x58c   :  { %1499 = vtanh.f32 %v751_v6 }
 0x58d   :  { %v755_v7 = vpop.f32.mrb[30].mxu0 }
 0x58e   :  { %v756_v8 = vadd.f32 %v755_v7, %v1720_v37  ;;  %v1283_v9 = vpop.f32.mrb[31].mxu0 }
 0x590   :  { %1501 = vtanh.f32 %v756_v8  ;;  %v903_v8 = vpop.permute.xlu0 %902 }
 0x591   :  { %v760_v10 = vpop.f32.mrb[32].mxu0 }
 0x592   :  { %v1286_v11 = vpop.f32.mrb[33].mxu0  ;;  %v761_v12 = vadd.f32 %v760_v10, %v1723_v42 }
 0x594   :  { %1503 = vtanh.f32 %v761_v12 }
 0x595   :  { %v765_v13 = vpop.f32.mrb[34].mxu0 }
 0x596   :  { %v766_v15 = vadd.f32 %v765_v13, %v1726_v45  ;;  %v1289_v16 = vpop.f32.mrb[35].mxu0  ;;  %v1500_v17 = vpop.eup %1499 }
 0x598   :  { %1505 = vtanh.f32 %v766_v15 }
 0x599   :  { %v770_v18 = vpop.f32.mrb[36].mxu0 }
 0x59a   :  { %v1502_v19 = vpop.eup %1501  ;;  %v1292_v20 = vpop.f32.mrb[37].mxu0  ;;  %v771_v21 = vadd.f32 %v770_v18, %v1729_v52 }
 0x59b   :  { %v1397_v23 = vpack.c.bf16 %v1502_v19, %v1500_v17 }
 0x59c   :  { %1507 = vtanh.f32 %v771_v21 }
 0x59d   :  { %v775_v24 = vpop.f32.mrb[38].mxu0  ;;  %1398 = vmatpush3.bf16.msra.mxu1 %v1397_v23 }
 0x59e   :  { %v776_v26 = vadd.f32 %v775_v24, %v1732_v56  ;;  %v1295_v34 = vpop.f32.mrb[39].mxu0  ;;  %1399 = vmatprep.subr.bf16.mxu1 %v1529_v14  ;;  %v1504_v35 = vpop.eup %1503 }
 0x5a0   :  { %1509 = vtanh.f32 %v776_v26 }
 0x5a1   :  { %v780_v36 = vpop.f32.mrb[40].mxu0 }
 0x5a2   :  { %v1506_v38 = vpop.eup %1505  ;;  %v781_v39 = vadd.f32 %v780_v36, %v1736_v61  ;;  %v1298_v40 = vpop.f32.mrb[41].mxu0 }
 0x5a3   :  { %v1400_v41 = vpack.c.bf16 %v1506_v38, %v1504_v35 }
 0x5a4   :  { %1511 = vtanh.f32 %v781_v39 }
 0x5a5   :  { %1401 = vmatpush3.bf16.msra.mxu1 %v1400_v41 }
 0x5a6   :  { %1402 = vmatprep.subr.bf16.mxu1 %v1529_v14  ;;  %v1508_v43 = vpop.eup %1507 }
 0x5aa   :  { %v1510_v44 = vpop.eup %1509 }
 0x5ab   :  { %v1403_v46 = vpack.c.bf16 %v1510_v44, %v1508_v43 }
 0x5ad   :  { %1404 = vmatpush3.bf16.msra.mxu1 %v1403_v46 }
 0x5ae   :  { %1311 = vmatprep.subr.mxu1 %v1531_v22  ;;  %v1512_v47 = vpop.eup %1511 }
 0x5b1   :  { %1312 = vmatpush3.msra.mxu1 %v1512_v47 }
 0x5b2   :  { %1314 = vmatmul.mubr.msk.f32.vlgmr.msra.gmra.mrb[28].mxu1 %vm234_vm1, %v1656_v25 }
 0x5b3   :  { %1316 = vmatprep.mubr.msk.f32.mxu1 %vm1530_vm0, %v1531_v22 }
 0x5b6   :  { %1317 = vmatmul.mubr.msk.f32.gmra.mrb[30].mxu1 %vm234_vm1, %v1666_v27 }
 0x5b7   :  { %1319 = vmatprep.mubr.msk.f32.mxu1 %vm1530_vm0, %v1531_v22 }
 0x5ba   :  { %1320 = vmatmul.mubr.msk.f32.gmra.mrb[32].mxu1 %vm234_vm1, %v1675_v28 }
 0x5bb   :  { %1322 = vmatprep.mubr.msk.f32.mxu1 %vm1530_vm0, %v1531_v22 }
 0x5be   :  { %1323 = vmatmul.mubr.msk.f32.gmra.mrb[34].mxu1 %vm234_vm1, %v1684_v29 }
 0x5bf   :  { %1325 = vmatprep.mubr.msk.f32.mxu1 %vm1530_vm0, %v1531_v22 }
 0x5c2   :  { %1326 = vmatmul.mubr.msk.f32.gmra.mrb[36].mxu1 %vm234_vm1, %v1693_v30 }
 0x5c3   :  { %1328 = vmatprep.mubr.msk.f32.mxu1 %vm1530_vm0, %v1531_v22 }
 0x5c6   :  { %1329 = vmatmul.mubr.msk.f32.gmra.mrb[38].mxu1 %vm234_vm1, %v1702_v31 }
 0x5c7   :  { %1331 = vmatprep.mubr.msk.f32.mxu1 %vm1530_vm0, %v1531_v22 }
 0x5ca   :  { %1332 = vmatmul.mubr.msk.f32.gmra.mrb[40].mxu1 %vm234_vm1, %v1711_v32 }
 0x685   :  { %v857_v25 = vpop.f32.mrb[28].mxu1 }
 0x686   :  { %v1315_v27 = vpop.f32.mrb[29].mxu1  ;;  %v858_v28 = vadd.f32 %v857_v25, %v1717_v33 }
 0x688   :  { %1513 = vtanh.f32 %v858_v28 }
 0x689   :  { %v862_v29 = vpop.f32.mrb[30].mxu1 }
 0x68a   :  { %v863_v48 = vadd.f32 %v862_v29, %v1720_v37  ;;  %v1318_v30 = vpop.f32.mrb[31].mxu1 }
 0x68c   :  { %1515 = vtanh.f32 %v863_v48 }
 0x68d   :  { %v867_v49 = vpop.f32.mrb[32].mxu1 }
 0x68e   :  { %v1321_v50 = vpop.f32.mrb[33].mxu1  ;;  %v868_v31 = vadd.f32 %v867_v49, %v1723_v42 }
 0x690   :  { %1517 = vtanh.f32 %v868_v31 }
 0x691   :  { %v872_v51 = vpop.f32.mrb[34].mxu1 }
 0x692   :  { %v873_v53 = vadd.f32 %v872_v51, %v1726_v45  ;;  %v1324_v54 = vpop.f32.mrb[35].mxu1  ;;  %v1514_v32 = vpop.eup %1513 }
 0x694   :  { %1519 = vtanh.f32 %v873_v53 }
 0x695   :  { %v877_v55 = vpop.f32.mrb[36].mxu1 }
 0x696   :  { %v1516_v57 = vpop.eup %1515  ;;  %v1327_v33 = vpop.f32.mrb[37].mxu1  ;;  %v878_v58 = vadd.f32 %v877_v55, %v1729_v52 }
 0x697   :  { %v1406_v37 = vpack.c.bf16 %v1516_v57, %v1514_v32 }
 0x698   :  { %1521 = vtanh.f32 %v878_v58 }
 0x699   :  { %v882_v59 = vpop.f32.mrb[38].mxu1  ;;  %1407 = vmatpush3.bf16.msra.mxu0 %v1406_v37 }
 0x69a   :  { %v883_v60 = vadd.f32 %v882_v59, %v1732_v56  ;;  %v1330_v62 = vpop.f32.mrb[39].mxu1  ;;  %1408 = vmatprep.subr.bf16.mxu0 %v1529_v14  ;;  %v1518_v42 = vpop.eup %1517  ;;  %v891_v56 = vld [vmem:[%s1946_s5] sm:$0x1] }
 0x69c   :  { %1523 = vtanh.f32 %v883_v60 }
 0x69d   :  { %v887_v45 = vpop.f32.mrb[40].mxu1 }
 0x69e   :  { %v1520_v63 = vpop.eup %1519  ;;  %v888_v0 = vadd.f32 %v887_v45, %v1736_v61  ;;  %v1333_v1 = vpop.f32.mrb[41].mxu1  ;;  %v905_v61 = vlaneseq }
 0x69f   :  { %v1409_v2 = vpack.c.bf16 %v1520_v63, %v1518_v42 }
 0x6a0   :  { %1525 = vtanh.f32 %v888_v0  ;;  %v906_v6 = vshrl.u32 %v905_v61, 7 }
 0x6a1   :  { %1410 = vmatpush3.bf16.msra.mxu0 %v1409_v2 }
 0x6a2   :  { %1411 = vmatprep.subr.bf16.mxu0 %v1529_v14  ;;  %v1522_v52 = vpop.eup %1521  ;;  %v907_v7 = vsub.s32 0, %v906_v6 }
 0x6a4   :  { %v908_v9 = vrot.slane %v903_v8, %v907_v7 }
 0x6a6   :  { %v1524_v3 = vpop.eup %1523 }
 0x6a7   :  { %v1412_v4 = vpack.c.bf16 %v1524_v3, %v1522_v52 }
 0x6a9   :  { %1413 = vmatpush3.bf16.msra.mxu0 %v1412_v4 }
 0x6aa   :  { %1346 = vmatprep.subr.mxu0 %v1531_v22  ;;  %v1526_v5 = vpop.eup %1525 }
 0x6ad   :  { %1347 = vmatpush3.msra.mxu0 %v1526_v5 }
 0x6ae   :  { %1349 = vmatmul.mubr.msk.f32.vlgmr.msra.gmra.mrb[42].mxu0 %vm234_vm1, %v891_v56 }
 0x781   :  { %v978_v14 = vpop.f32.mrb[42].mxu0 }
 0x782   :  { %v979_v10 = vadd.f32 %v978_v14, %v908_v9  ;;  %v1350_v11 = vpop.f32.mrb[43].mxu0 }
 0x784   :  { %982 = vst [vmem:[%s1947_s7] sm:$0x1] %v979_v10 }

</bundles_post_ra>
